<compile_context>
chip_gen: v6e
topology: v6e:2x2x1
jax: 0.10.0
libtpu: 0.0.40
codegen_flags: <defaults>
</compile_context>

<pallas_src>
import functools

import jax
import jax.numpy as jnp
from jax import lax
from jax.experimental import pallas as pl
from jax.experimental.pallas import tpu as pltpu


def _round_up(x: int, m: int) -> int:
    return ((x + m - 1) // m) * m


def _round_down(x: int, m: int) -> int:
    return (x // m) * m


def _cdiv(a: int, b: int) -> int:
    return (a + b - 1) // b


# Sublane packing per element size (f32 -> 8, bf16 -> 16, int8/fp8 -> 32).
_SUBLANE = {4: 8, 2: 16, 1: 32}


def _lm_loss_kernel(logits_ref, targets_ref, loss_ref,
                    m_acc, l_acc, w_acc, *,
                    label_smoothing: float, vocab_size: int,
                    ignore_index: int, needs_mask: bool):
    """Streaming per-token cross entropy with label smoothing.

    loss_i = logsumexp_j(x_ij) - (1-eps) * x_{i,t_i} - (eps/V) * sum_j x_ij,
    loss_i = 0 where t_i == ignore_index.
    """
    vk = pl.program_id(1)
    last = pl.num_programs(1) - 1

    @pl.when(vk == 0)
    def _init():
        m_acc[...] = jnp.full_like(m_acc, -jnp.inf)
        l_acc[...] = jnp.zeros_like(l_acc)
        w_acc[...] = jnp.zeros_like(w_acc)

    x_raw = logits_ref[...]                       # (TN, TV), input dtype
    tgt = targets_ref[...]                        # (TN, 1) int32
    tn, tv = x_raw.shape

    # Chunk-local lane index; shift the scalar (target / bound), not the tile.
    col = lax.broadcasted_iota(jnp.int32, (tn, tv), 1)
    tgt_local = tgt - vk * tv                     # (TN, 1)

    one_minus_eps = jnp.float32(1.0 - label_smoothing)
    smooth_w = jnp.float32(label_smoothing / vocab_size)

    def _update(valid_cols):
        # Running max on the raw-dtype tile (bf16 VALU on v6e/v7x); one upcast.
        if valid_cols is None:
            xm_raw = x_raw
        else:
            xm_raw = jnp.where(valid_cols, x_raw,
                               jnp.array(-jnp.inf, dtype=x_raw.dtype))
        chunk_max = jnp.max(xm_raw, axis=-1, keepdims=True).astype(jnp.float32)
        m_prev = m_acc[...]
        m_new = jnp.maximum(m_prev, chunk_max)
        alpha = jnp.exp(m_prev - m_new)           # 0 on the first chunk

        x = x_raw.astype(jnp.float32)
        e = jnp.exp(x - m_new)
        if valid_cols is not None:
            e = jnp.where(valid_cols, e, jnp.float32(0.0))
        l_acc[...] = alpha * l_acc[...] + jnp.sum(e, axis=-1, keepdims=True)
        m_acc[...] = m_new

        # Decomposed weighted-sum: (1-eps) * x_target + (eps/V) * sum_valid(x).
        tgt_term = jnp.sum(jnp.where(col == tgt_local, x, jnp.float32(0.0)),
                           axis=-1, keepdims=True)
        w_new = w_acc[...] + one_minus_eps * tgt_term
        if label_smoothing != 0.0:                # static specialization
            xs = x if valid_cols is None else jnp.where(valid_cols, x,
                                                        jnp.float32(0.0))
            w_new = w_new + smooth_w * jnp.sum(xs, axis=-1, keepdims=True)
        w_acc[...] = w_new

    def _finalize():
        lse = m_acc[...] + jnp.log(l_acc[...])    # (TN, 1)
        loss = lse - w_acc[...]
        loss_ref[...] = jnp.where(tgt != ignore_index, loss, jnp.float32(0.0))

    if needs_mask:
        # Interior chunks: no column masking at all.
        @pl.when(vk != last)
        def _interior():
            _update(None)

        # Final chunk: mask the padded columns (OOB loads are garbage), then
        # finalize.
        @pl.when(vk == last)
        def _tail():
            valid_cols = col < (jnp.int32(vocab_size) - vk * tv)
            _update(valid_cols)
            _finalize()
    else:
        _update(None)

        @pl.when(vk == last)
        def _tail():
            _finalize()


def _pick_vocab_tile(v: int, cap: int = 4096) -> int:
    """Vocab chunk width: full vocab if small, else a 128-multiple divisor."""
    if v <= cap:
        return v                                  # single full-width chunk
    # Prefer an exact divisor (multiple of 128, >= 2048) so no chunk is masked.
    for t in range(_round_down(cap, 128), 2047, -128):
        if v % t == 0:
            return t
    return cap                                    # masked tail chunk only


def _vmem_limit_bytes() -> int:
    """Per-generation scoped-VMEM limit (v7x has only 64 MiB physical)."""
    try:
        info = pltpu.get_tpu_info()
        cap = getattr(info, "vmem_capacity_bytes", None)
        if cap:
            return int(min(cap // 2, 64 * 1024 * 1024))
    except Exception:
        pass
    return 32 * 1024 * 1024


def _per_token_loss(logits2d, targets2d, *, label_smoothing, ignore_index,
                    row_tile=None, vocab_tile=None):
    """Per-token loss, shape (N,). logits2d: (N, V); targets2d: (N, 1) int32."""
    n, v = logits2d.shape
    itemsize = jnp.dtype(logits2d.dtype).itemsize
    sublane = _SUBLANE.get(itemsize, 8)

    # --- vocab chunk ----------------------------------------------------
    if vocab_tile is None:
        vocab_tile = _pick_vocab_tile(v)
    else:
        vocab_tile = _round_up(int(vocab_tile), 128) if int(vocab_tile) != v \
            else int(vocab_tile)
    needs_mask = (v % vocab_tile) != 0

    # --- row tile --------------------------------------------------------
    # Per-step working set ~= 2x double-buffered logits block
    #                         + ~3 live f32 full-tile temporaries.
    if row_tile is None:
        work_budget = 18 * 1024 * 1024
        per_elem = 2 * itemsize + 12
        row_tile = work_budget // (per_elem * vocab_tile)
        row_tile = max(sublane, min(1024, int(row_tile)))
        row_tile = _round_down(row_tile, sublane)
        # Guarantee >= 2 row tiles when possible (feed both v7x TensorCores).
        if n > sublane and _cdiv(n, row_tile) < 2:
            row_tile = _round_up(_cdiv(n, 2), sublane)
    else:
        row_tile = _round_up(int(row_tile), sublane)
    row_tile = min(row_tile, _round_up(n, sublane))

    grid = (_cdiv(n, row_tile), _cdiv(v, vocab_tile))

    kernel = functools.partial(
        _lm_loss_kernel,
        label_smoothing=float(label_smoothing),
        vocab_size=int(v),
        ignore_index=int(ignore_index),
        needs_mask=bool(needs_mask),
    )

    # TODO(synk): on v5e with f32 inputs a pipeline_mode=pl.Buffered(3) on the
    # logits BlockSpec can hide DMA-issue latency; left at the default depth to
    # keep the VMEM budget valid on v7x.
    out = pl.pallas_call(
        kernel,
        out_shape=jax.ShapeDtypeStruct((n, 1), jnp.float32),
        grid=grid,
        in_specs=[
            # logits chunk: rows x vocab-chunk
            pl.BlockSpec((row_tile, vocab_tile), lambda i, k: (i, k)),
            # targets: same row tile for every vocab chunk (tiny DMA)
            pl.BlockSpec((row_tile, 1), lambda i, k: (i, 0)),
        ],
        # Output block index independent of the vocab axis -> stays resident in
        # VMEM across the reduction and is only written at the last chunk.
        out_specs=pl.BlockSpec((row_tile, 1), lambda i, k: (i, 0)),
        scratch_shapes=[
            pltpu.VMEM((row_tile, 1), jnp.float32),   # running max m
            pltpu.VMEM((row_tile, 1), jnp.float32),   # running sum-exp l
            pltpu.VMEM((row_tile, 1), jnp.float32),   # weighted-sum (tgt+smooth)
        ],
        compiler_params=pltpu.CompilerParams(
            dimension_semantics=("parallel", "arbitrary"),
            vmem_limit_bytes=_vmem_limit_bytes(),
        ),
        cost_estimate=pl.CostEstimate(
            flops=int(6 * n * v),
            transcendentals=int(n * v),
            bytes_accessed=int(n * v * itemsize + 3 * n * 4),
        ),
    )(logits2d, targets2d)
    return out[:, 0]


def language_modeling_loss(logits, targets, attention_mask=None, *,
                           ignore_index=-100, reduction="mean",
                           label_smoothing=0.0, row_tile=None, vocab_tile=None):
    """JAX/Pallas equivalent of LanguageModelingLoss.forward."""
    b, s, v = logits.shape
    n = b * s
    logits2 = logits.reshape(n, v)
    targets2 = targets.reshape(n, 1).astype(jnp.int32)

    per_token = _per_token_loss(
        logits2, targets2,
        label_smoothing=label_smoothing, ignore_index=ignore_index,
        row_tile=row_tile, vocab_tile=vocab_tile)                        # (N,)

    if attention_mask is not None:
        mask = attention_mask.reshape(-1).astype(jnp.float32)
        masked = per_token * mask
        if reduction == "mean":
            msum = jnp.sum(mask)
            return jnp.where(msum > 0, jnp.sum(masked) / msum, jnp.float32(0.0))
        elif reduction == "sum":
            return jnp.sum(masked)
        else:
            return masked.reshape(b, s)
    else:
        if reduction == "mean":
            # Matches the PyTorch module: loss.mean() over ALL tokens (ignored
            # tokens contribute 0 to the numerator but count in denominator).
            return jnp.mean(per_token)
        elif reduction == "sum":
            return jnp.sum(per_token)
        else:
            return per_token.reshape(b, s)


def _reference_loss(logits, targets, attention_mask, *,
                    ignore_index, reduction, label_smoothing):
    """Pure-JAX reference for sanity checking."""
    b, s, v = logits.shape
    x = logits.reshape(-1, v).astype(jnp.float32)
    t = targets.reshape(-1).astype(jnp.int32)
    lse = jax.scipy.special.logsumexp(x, axis=-1)
    safe_t = jnp.where(t == ignore_index, 0, t)
    tgt_logit = jnp.take_along_axis(x, safe_t[:, None], axis=-1)[:, 0]
    eps = label_smoothing
    loss = lse - (1.0 - eps) * tgt_logit - eps * jnp.mean(x, axis=-1)
    loss = jnp.where(t == ignore_index, 0.0, loss)
    if attention_mask is not None:
        mask = attention_mask.reshape(-1).astype(jnp.float32)
        loss = loss * mask
        if reduction == "mean":
            msum = jnp.sum(mask)
            return jnp.where(msum > 0, jnp.sum(loss) / msum, 0.0)
        if reduction == "sum":
            return jnp.sum(loss)
        return loss.reshape(b, s)
    if reduction == "mean":
        return jnp.mean(loss)
    if reduction == "sum":
        return jnp.sum(loss)
    return loss.reshape(b, s)


if __name__ == "__main__":
    key = jax.random.PRNGKey(0)

    # (B, S, V, dtype, row_tile, vocab_tile, label_smoothing, tol)
    configs = [
        # small vocab, single chunk that divides exactly (no masking at all)
        (2, 8, 128, jnp.float32, None, None, 0.1, 1e-4),
        # multi-chunk streaming lse, masked tail chunk AND partial row tile
        (2, 24, 320, jnp.float32, 32, 128, 0.1, 1e-4),
        # multi-chunk, exact divide (no mask), label_smoothing == 0 fast path
        (2, 16, 512, jnp.float32, None, 128, 0.0, 1e-4),
        # bf16, multi-chunk, exact divide, raw-dtype max path
        (2, 16, 384, jnp.bfloat16, 16, 128, 0.1, 2e-3),
        # bf16, single full-width chunk (V not a multiple of 128), eps == 0,
        # partial row tiles
        (2, 12, 320, jnp.bfloat16, None, None, 0.0, 2e-3),
    ]

    ok = True
    for cfg_idx, (B, S, V, dtype, rt, vt, ls, tol) in enumerate(configs):
        k_logits, k_tgt, k_mask, key = jax.random.split(key, 4)
        logits = (4.0 * jax.random.normal(
            k_logits, (B, S, V), dtype=jnp.float32)).astype(dtype)
        targets = jax.random.randint(k_tgt, (B, S), 0, V, dtype=jnp.int32)
        # Mark a couple of positions as ignored.
        targets = targets.at[0, 0].set(-100).at[1, 3].set(-100)
        attention_mask = (jax.random.uniform(k_mask, (B, S)) > 0.25
                          ).astype(jnp.float32)

        for reduction in ("mean", "sum", "none"):
            for am in (attention_mask, None):
                out = language_modeling_loss(
                    logits, targets, am,
                    ignore_index=-100, reduction=reduction,
                    label_smoothing=ls, row_tile=rt, vocab_tile=vt)
                out = jax.block_until_ready(out)
                ref = _reference_loss(
                    logits, targets, am,
                    ignore_index=-100, reduction=reduction,
                    label_smoothing=ls)
                if not jnp.allclose(out, ref, atol=tol, rtol=tol):
                    ok = False
                    print("MISMATCH", cfg_idx, reduction, am is not None)

    if ok:
        print("KERNEL_OK")
</pallas_src>

<mosaic_0001>
module attributes {stable_mosaic.version = 11 : i64} {
  func.func @_lm_loss_kernel(%arg0: i32, %arg1: i32, %arg2: memref<8x128xf32, #tpu.memory_space<vmem>>, %arg3: memref<8x1xi32, #tpu.memory_space<vmem>>, %arg4: memref<8x1xf32, #tpu.memory_space<vmem>>, %arg5: memref<8x1xf32, #tpu.memory_space<vmem>>, %arg6: memref<8x1xf32, #tpu.memory_space<vmem>>, %arg7: memref<8x1xf32, #tpu.memory_space<vmem>>) attributes {dimension_semantics = [#tpu.dimension_semantics<parallel>, #tpu.dimension_semantics<arbitrary>], iteration_bounds = array<i64: 2, 1>, scalar_prefetch = 0 : i64, scratch_operands = 3 : i64, tpu.core_type = #tpu.core_type<tc>, window_params = [{transform_indices = @transform_0, window_bounds = array<i64: 8, 128>}, {transform_indices = @transform_1, window_bounds = array<i64: 8, 1>}, {transform_indices = @transform_2, window_bounds = array<i64: 8, 1>}]} {
    %c0_i32 = arith.constant 0 : i32
    %0 = arith.cmpi eq, %arg1, %c0_i32 : i32
    %1 = arith.extui %0 : i1 to i32
    %c0_i32_0 = arith.constant 0 : i32
    %2 = arith.cmpi ne, %1, %c0_i32_0 : i32
    scf.if %2 {
      %cst_24 = arith.constant 0xFF800000 : f32
      %44 = vector.broadcast %cst_24 : f32 to vector<8x1xf32>
      %c0_25 = arith.constant 0 : index
      %c0_26 = arith.constant 0 : index
      %45 = vector.load %arg5[%c0_25, %c0_26] : memref<8x1xf32, #tpu.memory_space<vmem>>, vector<8x1xf32>
      tpu.vector_store %arg5[%c0_25, %c0_26], %44 {strides = array<i32>} : memref<8x1xf32, #tpu.memory_space<vmem>>, vector<8x1xf32>,
      %cst_27 = arith.constant 0.000000e+00 : f32
      %46 = vector.broadcast %cst_27 : f32 to vector<8x1xf32>
      %c0_28 = arith.constant 0 : index
      %c0_29 = arith.constant 0 : index
      %47 = vector.load %arg6[%c0_28, %c0_29] : memref<8x1xf32, #tpu.memory_space<vmem>>, vector<8x1xf32>
      tpu.vector_store %arg6[%c0_28, %c0_29], %46 {strides = array<i32>} : memref<8x1xf32, #tpu.memory_space<vmem>>, vector<8x1xf32>,
      %cst_30 = arith.constant 0.000000e+00 : f32
      %48 = vector.broadcast %cst_30 : f32 to vector<8x1xf32>
      %c0_31 = arith.constant 0 : index
      %c0_32 = arith.constant 0 : index
      %49 = vector.load %arg7[%c0_31, %c0_32] : memref<8x1xf32, #tpu.memory_space<vmem>>, vector<8x1xf32>
      tpu.vector_store %arg7[%c0_31, %c0_32], %48 {strides = array<i32>} : memref<8x1xf32, #tpu.memory_space<vmem>>, vector<8x1xf32>,
    } else {
    }
    %c0 = arith.constant 0 : index
    %c0_1 = arith.constant 0 : index
    %3 = vector.load %arg2[%c0, %c0_1] : memref<8x128xf32, #tpu.memory_space<vmem>>, vector<8x128xf32>
    %c0_2 = arith.constant 0 : index
    %c0_3 = arith.constant 0 : index
    %4 = vector.load %arg3[%c0_2, %c0_3] : memref<8x1xi32, #tpu.memory_space<vmem>>, vector<8x1xi32>
    %5 = tpu.iota {dimensions = array<i32: 1>} : vector<8x128xi32>
    %c128_i32 = arith.constant 128 : i32
    %6 = arith.muli %arg1, %c128_i32 : i32
    %7 = vector.broadcast %6 : i32 to vector<8x1xi32>
    %8 = arith.subi %4, %7 : vector<8x1xi32>
    %cst = arith.constant dense<0xFF800000> : vector<8xf32>
    %9 = vector.multi_reduction <maximumf>, %3, %cst [1] : vector<8x128xf32> to vector<8xf32>
    %10 = vector.shape_cast %9 : vector<8xf32> to vector<8x1xf32>
    %c0_4 = arith.constant 0 : index
    %c0_5 = arith.constant 0 : index
    %11 = vector.load %arg5[%c0_4, %c0_5] : memref<8x1xf32, #tpu.memory_space<vmem>>, vector<8x1xf32>
    %12 = arith.maximumf %11, %10 : vector<8x1xf32>
    %13 = arith.subf %11, %12 : vector<8x1xf32>
    %14 = math.exp %13 : vector<8x1xf32>
    %15 = vector.broadcast %12 : vector<8x1xf32> to vector<8x128xf32>
    %16 = arith.subf %3, %15 : vector<8x128xf32>
    %17 = math.exp %16 : vector<8x128xf32>
    %c0_6 = arith.constant 0 : index
    %c0_7 = arith.constant 0 : index
    %18 = vector.load %arg6[%c0_6, %c0_7] : memref<8x1xf32, #tpu.memory_space<vmem>>, vector<8x1xf32>
    %19 = arith.mulf %14, %18 : vector<8x1xf32>
    %cst_8 = arith.constant dense<0.000000e+00> : vector<8xf32>
    %20 = vector.multi_reduction <add>, %17, %cst_8 [1] : vector<8x128xf32> to vector<8xf32>
    %21 = vector.shape_cast %20 : vector<8xf32> to vector<8x1xf32>
    %22 = arith.addf %19, %21 : vector<8x1xf32>
    %c0_9 = arith.constant 0 : index
    %c0_10 = arith.constant 0 : index
    %23 = vector.load %arg6[%c0_9, %c0_10] : memref<8x1xf32, #tpu.memory_space<vmem>>, vector<8x1xf32>
    tpu.vector_store %arg6[%c0_9, %c0_10], %22 {strides = array<i32>} : memref<8x1xf32, #tpu.memory_space<vmem>>, vector<8x1xf32>,
    %c0_11 = arith.constant 0 : index
    %c0_12 = arith.constant 0 : index
    %24 = vector.load %arg5[%c0_11, %c0_12] : memref<8x1xf32, #tpu.memory_space<vmem>>, vector<8x1xf32>
    tpu.vector_store %arg5[%c0_11, %c0_12], %12 {strides = array<i32>} : memref<8x1xf32, #tpu.memory_space<vmem>>, vector<8x1xf32>,
    %25 = vector.broadcast %8 : vector<8x1xi32> to vector<8x128xi32>
    %26 = arith.cmpi eq, %5, %25 : vector<8x128xi32>
    %cst_13 = arith.constant 0.000000e+00 : f32
    %27 = vector.broadcast %cst_13 : f32 to vector<8x128xf32>
    %28 = arith.select %26, %3, %27 : vector<8x128xi1>, vector<8x128xf32>
    %cst_14 = arith.constant dense<0.000000e+00> : vector<8xf32>
    %29 = vector.multi_reduction <add>, %28, %cst_14 [1] : vector<8x128xf32> to vector<8xf32>
    %30 = vector.shape_cast %29 : vector<8xf32> to vector<8x1xf32>
    %c0_15 = arith.constant 0 : index
    %c0_16 = arith.constant 0 : index
    %31 = vector.load %arg7[%c0_15, %c0_16] : memref<8x1xf32, #tpu.memory_space<vmem>>, vector<8x1xf32>
    %cst_17 = arith.constant 0.899999976 : f32
    %32 = vector.broadcast %cst_17 : f32 to vector<8x1xf32>
    %33 = arith.mulf %32, %30 : vector<8x1xf32>
    %34 = arith.addf %31, %33 : vector<8x1xf32>
    %cst_18 = arith.constant dense<0.000000e+00> : vector<8xf32>
    %35 = vector.multi_reduction <add>, %3, %cst_18 [1] : vector<8x128xf32> to vector<8xf32>
    %36 = vector.shape_cast %35 : vector<8xf32> to vector<8x1xf32>
    %cst_19 = arith.constant 7.812500e-04 : f32
    %37 = vector.broadcast %cst_19 : f32 to vector<8x1xf32>
    %38 = arith.mulf %37, %36 : vector<8x1xf32>
    %39 = arith.addf %34, %38 : vector<8x1xf32>
    %c0_20 = arith.constant 0 : index
    %c0_21 = arith.constant 0 : index
    %40 = vector.load %arg7[%c0_20, %c0_21] : memref<8x1xf32, #tpu.memory_space<vmem>>, vector<8x1xf32>
    tpu.vector_store %arg7[%c0_20, %c0_21], %39 {strides = array<i32>} : memref<8x1xf32, #tpu.memory_space<vmem>>, vector<8x1xf32>,
    %c0_i32_22 = arith.constant 0 : i32
    %41 = arith.cmpi eq, %arg1, %c0_i32_22 : i32
    %42 = arith.extui %41 : i1 to i32
    %c0_i32_23 = arith.constant 0 : i32
    %43 = arith.cmpi ne, %42, %c0_i32_23 : i32
    scf.if %43 {
      %c0_24 = arith.constant 0 : index
      %c0_25 = arith.constant 0 : index
      %44 = vector.load %arg5[%c0_24, %c0_25] : memref<8x1xf32, #tpu.memory_space<vmem>>, vector<8x1xf32>
      %c0_26 = arith.constant 0 : index
      %c0_27 = arith.constant 0 : index
      %45 = vector.load %arg6[%c0_26, %c0_27] : memref<8x1xf32, #tpu.memory_space<vmem>>, vector<8x1xf32>
      %46 = math.log %45 : vector<8x1xf32>
      %47 = arith.addf %44, %46 : vector<8x1xf32>
      %c0_28 = arith.constant 0 : index
      %c0_29 = arith.constant 0 : index
      %48 = vector.load %arg7[%c0_28, %c0_29] : memref<8x1xf32, #tpu.memory_space<vmem>>, vector<8x1xf32>
      %49 = arith.subf %47, %48 : vector<8x1xf32>
      %c-100_i32 = arith.constant -100 : i32
      %50 = vector.broadcast %c-100_i32 : i32 to vector<8x1xi32>
      %51 = arith.cmpi ne, %4, %50 : vector<8x1xi32>
      %cst_30 = arith.constant 0.000000e+00 : f32
      %52 = vector.broadcast %cst_30 : f32 to vector<8x1xf32>
      %53 = arith.select %51, %49, %52 : vector<8x1xi1>, vector<8x1xf32>
      %c0_31 = arith.constant 0 : index
      %c0_32 = arith.constant 0 : index
      %54 = vector.load %arg4[%c0_31, %c0_32] : memref<8x1xf32, #tpu.memory_space<vmem>>, vector<8x1xf32>
      tpu.vector_store %arg4[%c0_31, %c0_32], %53 {strides = array<i32>} : memref<8x1xf32, #tpu.memory_space<vmem>>, vector<8x1xf32>,
    } else {
    }
    return
  }
  func.func @transform_0(%arg0: i32, %arg1: i32) -> (i32, i32) {
    %c0_i32 = arith.constant 0 : i32
    return %arg0, %arg1 : i32, i32
  }
  func.func @transform_1(%arg0: i32, %arg1: i32) -> (i32, i32) {
    %c0_i32 = arith.constant 0 : i32
    %c0_i32_0 = arith.constant 0 : i32
    return %arg0, %c0_i32 : i32, i32
  }
  func.func @transform_2(%arg0: i32, %arg1: i32) -> (i32, i32) {
    %c0_i32 = arith.constant 0 : i32
    %c0_i32_0 = arith.constant 0 : i32
    return %arg0, %c0_i32 : i32, i32
  }
}

</mosaic_0001>

<bundles_post_ra>
// kernel: tpu_custom_call.1
= control target key start
LH: loop header
LB: loop body
LE: loop exit
PB: predicated region body
PF: predicated region fallthrough
CT: control target
= control target key end

     0   :  { %s408_s9 = smov 0   ;;  %s410_s10 = smov 0   ;;  %s456_s0 = inlined_call_operand.vmem [shape: f32[16,128], index: 0, kind: input, shape index: {}]   ;;  %s457_s1 = inlined_call_operand.vmem [shape: s32[16,1], index: 1, kind: input, shape index: {}]   ;;  %s458_s2 = inlined_call_operand.vmem [shape: f32[16,1], index: 2, kind: output, shape index: {}]  }
   0x1   :  { %s412_s11 = smov 0  }
   0x2 LB: > { %s24_s12 = sadd.s32 1, %s384_s10  ;;  %p325_p0 = scmp.ge.s32.totalorder %s388_s11, 1  ;;  %s388_s11 = sphi %s412_s11, %s12_s11   ;;  %s384_s10 = sphi %s410_s10, %s460_s10   ;;  %s380_s9 = sphi %s408_s9, %s459_s9  }
   0x3   : > { %p26_p1 = scmp.ge.s32.totalorder %s24_s12, 2  ;;  %p137_p2 = scmp.lt.s32.totalorder %s388_s11, 3 }
   0x5   : > { %s462_s12 = smov (%p26_p1, %s24_s12), 0  ;;  %p138_p3 = pnand %p325_p0, %p137_p2 }
   0x6   : > { %p164_p4 = scmp.lt.s32.totalorder (!%p138_p3), %s380_s9, 1 }
   0x7   : > { %141 = sbr.rel (%p138_p3) target bundleno = 468 (0x1d4), region = 28 }
   0xc   : > { %vm183_vm0 = vcmask 7168   ;;  %v390_v0 = vmov -inf   ;;  %s464_s9 = smov (!%p164_p4, %s380_s9), 1  ;;  %v391_v2 = vmov 0   ;;  %v392_v4 = vmov 0.0  }
   0xd   : > { %184 = vst.msk [vmem:[#allocation2] sm:$0xff] %vm183_vm0, %v390_v0  ;;  %s427_s13 = sshll.u32 %s464_s9, 3  ;;  %358 = vset.pattern.permute.xlu0 %v391_v2  ;;  %359 = vset.pattern.permute.xlu1 %v391_v2  ;;  %185 = vst.msk [vmem:[#allocation3] sm:$0xff] %vm183_vm0, %v392_v4  ;;  %v189_v12 = vlaneseq }
   0xe   : > { %s170_s16 = scalar_lea.vmem %s456_s0, %s427_s13  ;;  %s174_s19 = scalar_lea.vmem %s457_s1, %s427_s13  ;;  %186 = vst.msk [vmem:[#allocation4] sm:$0xff] %vm183_vm0, %v392_v4 }
   0xf   : > { %v187_v1 = vld [vmem:[%s170_s16] sm:$0xff]  ;;  %v190_v13 = vand.u32 127, %v189_v12  ;;  %s178_s22 = scalar_lea.vmem %s458_s2, %s427_s13 }
  0x10   : > { %194 = vmax.xlane.f32.xlu0 %v187_v1  ;;  %v188_v3 = vld [vmem:[%s174_s19] sm:$0xff] }
  0x11   : > { %218 = vperm.xlu1 %359, %v188_v3   ;;  %vm242_vm2 = vcmp.ne.s32.totalorder %v188_v3, 4294967196 }
  0x14   : > { %v196_v5 = vld [vmem:[#allocation2] sm:$0xff]  ;;  %v209_v19 = vld [vmem:[#allocation3] sm:$0xff] }
  0x15   : > { %v224_v23 = vld [vmem:[#allocation4] sm:$0xff] }
  0x8c   : > { %v219_v14 = vpop.permute.xlu1 %218 }
  0x8d   : > { %vm220_vm1 = vcmp.eq.s32.totalorder %v190_v13, %v219_v14 }
  0x8e   : > { %v221_v16 = vsel %vm220_vm1, %v187_v1, 0.0 }
  0x99   : > { %v195_v6 = vpop.xlane.xlu0 %194 }
  0x9a   : > { %v197_v7 = vmax.f32 %v196_v5, %v195_v6 }
  0x9c   : > { %v198_v8 = vsub.f32 %v196_v5, %v197_v7  ;;  %216 = vst.msk [vmem:[#allocation2] sm:$0xff] %vm183_vm0, %v197_v7  ;;  %203 = vperm.xlu0 %358, %v197_v7  }
  0x9e   : > { %v199_v17 = vmul.f32 1.442695, %v198_v8 }
  0xa3   : > { %v235_v33 = vld [vmem:[#allocation2] sm:$0xff] }
 0x117   : > { %v204_v9 = vpop.permute.xlu0 %203 }
 0x118   : > { %v206_v10 = vsub.f32 %v187_v1, %v204_v9 }
 0x11a   : > { %v207_v11 = vmul.f32 1.442695, %v206_v10 }
 0x11c   : > { %360 = vpow2.f32 %v207_v11 }
 0x11d   : > { %362 = vpow2.f32 %v199_v17 }
 0x129   : > { %v361_v15 = vpop.eup %360 }
 0x12a   : > { %211 = vadd.xlane.f32.xlu1 %v361_v15  ;;  %v363_v18 = vpop.eup %362 }
 0x12b   : > { %v210_v20 = vmul.f32 %v363_v18, %v209_v19 }
 0x12e   : > { %222 = vadd.xlane.f32.xlu1 %v221_v16 }
 0x132   : > { %227 = vadd.xlane.f32.xlu1 %v187_v1 }
 0x1b3   : > { %v212_v21 = vpop.xlane.xlu1 %211 }
 0x1b4   : > { %v213_v22 = vadd.f32 %v212_v21, %v210_v20 }
 0x1b6   : > { %215 = vst.msk [vmem:[#allocation3] sm:$0xff] %vm183_vm0, %v213_v22 }
 0x1b7   : > { %v223_v24 = vpop.xlane.xlu1 %222 }
 0x1b8   : > { %v225_v25 = vmul.f32 0.9, %v223_v24 }
 0x1ba   : > { %v226_v26 = vadd.f32 %v225_v25, %v224_v23 }
 0x1bb   : > { %v228_v27 = vpop.xlane.xlu1 %227 }
 0x1bc   : > { %v229_v28 = vmul.f32 0.00078125, %v228_v27 }
 0x1bd   : > { %v236_v29 = vld [vmem:[#allocation3] sm:$0xff] }
 0x1be   : > { %364 = vlog2.f32 %v236_v29  ;;  %v230_v30 = vadd.f32 %v229_v28, %v226_v26 }
 0x1c0   : > { %231 = vst.msk [vmem:[#allocation4] sm:$0xff] %vm183_vm0, %v230_v30 }
 0x1c7   : > { %v240_v35 = vld [vmem:[#allocation4] sm:$0xff] }
 0x1cb   : > { %v365_v31 = vpop.eup %364 }
 0x1cc   : > { %v238_v32 = vmul.f32 0.6931472, %v365_v31 }
 0x1ce   : > { %v239_v34 = vadd.f32 %v238_v32, %v235_v33 }
 0x1d0   : > { %v241_v36 = vsub.f32 %v239_v34, %v240_v35 }
 0x1d2   : > { %v243_v37 = vsel %vm242_vm2, %v241_v36, 0.0 }
 0x1d3   : > { %244 = vst.msk [vmem:[%s178_s22] sm:$0xff] %vm183_vm0, %v243_v37 }
 0x1d4 PF: > { %s12_s11 = sadd.s32 1, %s388_s11   ;;  %s459_s9 = smov %s384_s10 }
 0x1d5   : > { %p9_p5 = scmp.ge.s32.totalorder %s12_s11, 4   ;;  %s460_s10 = smov %s462_s12 }
 0x1d7   :  { %11 = sbr.rel (!%p9_p5) target bundleno = 2 (0x2), region = 69 }

</bundles_post_ra>
